<compile_context>
chip_gen: v6e
topology: v6e:2x2x1
jax: 0.10.0
libtpu: 0.0.40
codegen_flags: <defaults>
</compile_context>

<pallas_src>
import functools

import jax
import jax.numpy as jnp
from jax.experimental import pallas as pl
from jax.experimental.pallas import tpu as pltpu

EPS = 1e-5
NEG_SLOPE = 0.01
_ACC_BUDGET_BYTES = 512 * 1024        # cap on the per-tile (tl, C_out) f32 accumulator


def _round_up(v, m):
    return (v + m - 1) // m * m


def _tpu_vmem_capacity():
    try:
        cap = int(pltpu.get_tpu_info().vmem_capacity_bytes)
        if cap > 0:
            return cap
    except Exception:
        pass
    return 64 * 1024 * 1024           # conservative fallback (v7x-sized)


_VMEM_CAP = _tpu_vmem_capacity()
_VMEM_LIMIT = min(_VMEM_CAP * 3 // 4, 100 * 1024 * 1024)   # leave compiler headroom
_TL_TARGET = 1024 if _VMEM_CAP >= 128 * 1024 * 1024 else 512


# ----------------------------------------------------------------------------
# Conv (sum of per-tap matmuls) + fused previous-layer BN/LeakyReLU on the
# input + per-channel BN partial statistics accumulated across L-tiles.
# ----------------------------------------------------------------------------
def _conv_bn_stats_kernel(*refs, n_q, l_out, apply_prev):
    if n_q > 1:
        xm_ref, xt_ref, w_ref, pp_ref, y_ref, stat_ref, xw_ref = refs
    else:
        xm_ref, w_ref, pp_ref, y_ref, stat_ref = refs

    tl, c_out = y_ref.shape
    j = pl.program_id(1)

    def _prep(v):
        # Previous layer's BatchNorm affine + LeakyReLU, applied on load (f32).
        v = v.astype(jnp.float32)
        if apply_prev:
            v = v * pp_ref[0:1, :] + pp_ref[1:2, :]
            v = jnp.where(v > 0, v, NEG_SLOPE * v)
        return v

    if n_q > 1:
        # Assemble the overlapping window [j*tl, j*tl + tl + q_pad) in a VMEM
        # scratch from the main block and the small (aligned) tail block.
        xw_ref[0:tl, :] = _prep(xm_ref[...])
        xw_ref[tl:, :] = _prep(xt_ref[...])
        xw = xw_ref[...]
    else:
        xw = _prep(xm_ref[...])

    # Static unroll over conv taps (bf16 MXU matmuls, f32 accumulate).
    acc = jnp.dot(xw[0:tl, :].astype(jnp.bfloat16), w_ref[0],
                  preferred_element_type=jnp.float32)
    for q in range(1, n_q):
        acc = acc + jnp.dot(xw[q:q + tl, :].astype(jnp.bfloat16), w_ref[q],
                            preferred_element_type=jnp.float32)

    # Zero rows past the real L_out: keeps BN stats exact and lets the padded
    # activation be passed to the next layer without a slice copy.
    rows = j * tl + jax.lax.broadcasted_iota(jnp.int32, (tl, 1), 0)
    acc = jnp.where(rows < l_out, acc, 0.0)

    y_ref[...] = acc.astype(y_ref.dtype)

    # BN partial sums, accumulated in the VMEM-resident stats block (written
    # back to HBM once per batch element).  Row 0 = sum, row 1 = sum of squares.
    s1 = jnp.sum(acc, axis=0, keepdims=True)
    s2 = jnp.sum(acc * acc, axis=0, keepdims=True)
    ridx = jax.lax.broadcasted_iota(jnp.int32, (8, 1), 0)
    upd = jnp.where(ridx == 0, s1, 0.0) + jnp.where(ridx == 1, s2, 0.0)

    @pl.when(j == 0)
    def _():
        stat_ref[...] = jnp.zeros_like(stat_ref)

    stat_ref[...] = stat_ref[...] + upd


# ----------------------------------------------------------------------------
# Standalone BN (pre-folded scale/shift) + LeakyReLU: final layer only.
# ----------------------------------------------------------------------------
def _bn_lrelu_kernel(y_ref, p_ref, o_ref):
    z = y_ref[...].astype(jnp.float32) * p_ref[0:1, :] + p_ref[1:2, :]
    o_ref[...] = jnp.where(z > 0, z, NEG_SLOPE * z).astype(o_ref.dtype)


def _conv_block(x, valid_len, prev_affine, w, gamma, beta, k, s, y_dtype):
    """Conv1d (stride s, VALID) + train-mode BN statistics, fusing the PREVIOUS
    layer's BN scale/shift + LeakyReLU into the input load.

    x: (B, L_phys, C_in) channels-last; rows >= valid_len are zero (junk).
    Returns (y, L_out, (scale, shift), (tl, num_j)); y is the pre-BN conv
    output, shape (B, num_j*tl, C_out), with junk rows zeroed.
    """
    B, L_phys, C_in = x.shape
    C_out = w.shape[0]
    L_out = (valid_len - k) // s + 1
    assert L_out > 0
    n_q = (k - 1) // s + 1               # taps after folding the stride into channels
    cin_r = s * C_in
    q_pad = _round_up(n_q - 1, 8) if n_q > 1 else 0

    # Output-row tile: big enough to stream, small enough that the f32
    # accumulator + double-buffered blocks stay comfortably inside VMEM.
    tl_cap = max(64, (_ACC_BUDGET_BYTES // (4 * C_out)) // 8 * 8)
    tl = min(_TL_TARGET, tl_cap, _round_up(L_out, 8))
    if q_pad:
        tl = _round_up(tl, q_pad)
    tl = max(tl, 8)
    num_j = -(-L_out // tl)
    l_out_pad = num_j * tl
    lr_pad = l_out_pad + q_pad
    need = lr_pad * s

    # Pad or trim along L so the stride->channel fold is an exact (free) reshape.
    if L_phys == need:
        xp = x
    elif L_phys > need:
        xp = x[:, :need, :]
    else:
        xp = jnp.pad(x, ((0, 0), (0, need - L_phys), (0, 0)))
    xr = xp.reshape(B, lr_pad, cin_r)

    # Space-to-depth weights: tap q is a (s*C_in, C_out) matmul against folded
    # row j+q.  Conv bias dropped: it cancels under the BN mean subtraction.
    w_sd = jnp.zeros((n_q, s, C_in, C_out), jnp.float32)
    for t in range(k):
        w_sd = w_sd.at[t // s, t % s].set(jnp.transpose(w[:, :, t]))
    w_k = w_sd.reshape(n_q, cin_r, C_out).astype(jnp.bfloat16)

    # Previous layer's BN scale/shift, tiled s times to match the channel fold.
    apply_prev = prev_affine is not None
    pp = jnp.zeros((8, cin_r), jnp.float32)
    if apply_prev:
        sc, sh = prev_affine
        pp = pp.at[0].set(jnp.tile(sc, s)).at[1].set(jnp.tile(sh, s))

    in_specs = [pl.BlockSpec((None, tl, cin_r), lambda b, j: (b, j, 0))]
    inputs = [xr]
    if n_q > 1:
        tb = tl // q_pad
        in_specs.append(pl.BlockSpec((None, q_pad, cin_r),
                                     lambda b, j: (b, (j + 1) * tb, 0)))
        inputs.append(xr)            # same array: small overlapping tail window
    in_specs += [pl.BlockSpec(w_k.shape, lambda b, j: (0, 0, 0)),
                 pl.BlockSpec((8, cin_r), lambda b, j: (0, 0))]
    inputs += [w_k, pp]

    scratch = []
    if n_q > 1:
        scratch.append(pltpu.VMEM((tl + q_pad, cin_r), jnp.float32))

    kernel = functools.partial(_conv_bn_stats_kernel, n_q=n_q, l_out=L_out,
                               apply_prev=apply_prev)

    y, stats = pl.pallas_call(
        kernel,
        out_shape=(jax.ShapeDtypeStruct((B, l_out_pad, C_out), y_dtype),
                   jax.ShapeDtypeStruct((B, 8, C_out), jnp.float32)),
        grid=(B, num_j),
        in_specs=in_specs,
        out_specs=(pl.BlockSpec((None, tl, C_out), lambda b, j: (b, j, 0)),
                   pl.BlockSpec((None, 8, C_out), lambda b, j: (b, 0, 0))),
        scratch_shapes=scratch,
        compiler_params=pltpu.CompilerParams(
            dimension_semantics=("parallel", "arbitrary"),
            vmem_limit_bytes=_VMEM_LIMIT),
    )(*inputs)

    # Global training-mode BatchNorm statistics over all B*L_out rows
    # (tiny cross-batch reduction), folded into a single scale/shift pair.
    cnt = B * L_out
    mean = jnp.sum(stats[:, 0, :], axis=0) / cnt
    var = jnp.maximum(jnp.sum(stats[:, 1, :], axis=0) / cnt - mean * mean, 0.0)
    scale = gamma * jax.lax.rsqrt(var + EPS)
    shift = beta - mean * scale
    return y, L_out, (scale, shift), (tl, num_j)


def _final_bn_lrelu(y, affine, tl, num_j, valid_len):
    B, l_out_pad, C_out = y.shape
    scale, shift = affine
    pp = jnp.zeros((8, C_out), jnp.float32).at[0].set(scale).at[1].set(shift)
    out = pl.pallas_call(
        _bn_lrelu_kernel,
        out_shape=jax.ShapeDtypeStruct((B, l_out_pad, C_out), jnp.float32),
        grid=(B, num_j),
        in_specs=[pl.BlockSpec((None, tl, C_out), lambda b, j: (b, j, 0)),
                  pl.BlockSpec((8, C_out), lambda b, j: (0, 0))],
        out_specs=pl.BlockSpec((None, tl, C_out), lambda b, j: (b, j, 0)),
        compiler_params=pltpu.CompilerParams(
            dimension_semantics=("parallel", "parallel"),
            vmem_limit_bytes=_VMEM_LIMIT),
    )(y, pp)
    return out[:, :valid_len, :]


class CNN1dPallas:
    """Mirror of wavencoder CNN1d: stack of (Conv1d -> BatchNorm1d(train) -> LeakyReLU)."""

    def __init__(self, conv_layers, key):
        self.conv_layers = conv_layers
        self.params = []
        in_d = 1
        for dim, k, s in conv_layers:
            key, kw, kb = jax.random.split(key, 3)
            fan_in = in_d * k
            bound = 1.0 / (fan_in ** 0.5)
            w = jax.random.uniform(kw, (dim, in_d, k), jnp.float32, -bound, bound)
            b = jax.random.uniform(kb, (dim,), jnp.float32, -bound, bound)
            gamma = jnp.ones((dim,), jnp.float32)   # BN affine init
            beta = jnp.zeros((dim,), jnp.float32)
            self.params.append((w, b, gamma, beta))
            in_d = dim

    def __call__(self, x):
        # PyTorch NCL -> channels-last once (bf16 conv-input path).
        h = jnp.transpose(x, (0, 2, 1)).astype(jnp.bfloat16)
        valid = h.shape[1]
        affine = None
        tiling = (8, 1)
        n = len(self.conv_layers)
        for i, ((w, b, gamma, beta), (dim, k, s)) in enumerate(
                zip(self.params, self.conv_layers)):
            y_dtype = jnp.float32 if i == n - 1 else jnp.bfloat16
            h, valid, affine, tiling = _conv_block(
                h, valid, affine, w, gamma, beta, k, s, y_dtype)
        out = _final_bn_lrelu(h, affine, tiling[0], tiling[1], valid)
        # Back to PyTorch NCL layout.
        return jnp.transpose(out, (0, 2, 1))


def _reference_forward(model, x):
    """Pure-JAX/XLA reference (f32, with conv bias) for correctness checking."""
    for (w, b, gamma, beta), (dim, k, s) in zip(model.params, model.conv_layers):
        y = jax.lax.conv_general_dilated(
            x, w, window_strides=(s,), padding="VALID",
            dimension_numbers=("NCH", "OIH", "NCH"))
        y = y + b[None, :, None]
        mean = jnp.mean(y, axis=(0, 2), keepdims=True)
        var = jnp.mean((y - mean) ** 2, axis=(0, 2), keepdims=True)
        y = (y - mean) / jnp.sqrt(var + EPS)
        y = y * gamma[None, :, None] + beta[None, :, None]
        x = jnp.where(y > 0, y, NEG_SLOPE * y)
    return x


if __name__ == "__main__":
    key = jax.random.PRNGKey(0)
    key, kx = jax.random.split(key)

    # Small config: two blocks, (dim, kernel, stride).
    conv_layers = [(16, 3, 2), (32, 3, 2)]
    model = CNN1dPallas(conv_layers, key)

    # Input: (B=2, C_in=1, L=64), PyTorch NCL layout.
    x = jax.random.normal(kx, (2, 1, 64), jnp.float32)

    out = jax.jit(model.__call__)(x)
    out = jax.block_until_ready(out)

    # Sanity: shapes (64 -> 31 -> 15) and value match vs XLA f32 reference.
    assert out.shape == (2, 32, 15), out.shape
    ref = _reference_forward(model, x)
    max_err = float(jnp.max(jnp.abs(out - ref)))
    assert jnp.allclose(out, ref, rtol=2e-2, atol=2e-2), max_err

    print("KERNEL_OK")
</pallas_src>

<mosaic_0001>
module attributes {stable_mosaic.version = 11 : i64} {
  func.func @_conv_bn_stats_kernel(%arg0: i32, %arg1: i32, %arg2: memref<1x32x2xbf16, #tpu.memory_space<vmem>>, %arg3: memref<1x8x2xbf16, #tpu.memory_space<vmem>>, %arg4: memref<2x2x16xbf16, #tpu.memory_space<vmem>>, %arg5: memref<8x2xf32, #tpu.memory_space<vmem>>, %arg6: memref<1x32x16xbf16, #tpu.memory_space<vmem>>, %arg7: memref<1x8x16xf32, #tpu.memory_space<vmem>>, %arg8: memref<40x2xf32, #tpu.memory_space<vmem>>) attributes {dimension_semantics = [#tpu.dimension_semantics<parallel>, #tpu.dimension_semantics<arbitrary>], iteration_bounds = array<i64: 2, 1>, scalar_prefetch = 0 : i64, scratch_operands = 1 : i64, tpu.core_type = #tpu.core_type<tc>, window_params = [{transform_indices = @transform_0, window_bounds = array<i64: 1, 32, 2>}, {transform_indices = @transform_1, window_bounds = array<i64: 1, 8, 2>}, {pipeline_mode = #tpu.pipeline_mode<synchronous>, transform_indices = @transform_2, window_bounds = array<i64: 2, 2, 16>}, {pipeline_mode = #tpu.pipeline_mode<synchronous>, transform_indices = @transform_3, window_bounds = array<i64: 8, 2>}, {transform_indices = @transform_4, window_bounds = array<i64: 1, 32, 16>}, {transform_indices = @transform_5, window_bounds = array<i64: 1, 8, 16>}]} {
    %c0 = arith.constant 0 : index
    %c0_0 = arith.constant 0 : index
    %c0_1 = arith.constant 0 : index
    %0 = vector.load %arg2[%c0, %c0_0, %c0_1] : memref<1x32x2xbf16, #tpu.memory_space<vmem>>, vector<1x32x2xbf16>
    %1 = vector.shape_cast %0 : vector<1x32x2xbf16> to vector<32x2xbf16>
    %2 = arith.extf %1 : vector<32x2xbf16> to vector<32x2xf32>
    %c0_2 = arith.constant 0 : index
    %c0_3 = arith.constant 0 : index
    %3 = vector.load %arg8[%c0_2, %c0_3] : memref<40x2xf32, #tpu.memory_space<vmem>>, vector<32x2xf32>
    tpu.vector_store %arg8[%c0_2, %c0_3], %2 {strides = array<i32>} : memref<40x2xf32, #tpu.memory_space<vmem>>, vector<32x2xf32>,
    %c0_4 = arith.constant 0 : index
    %c0_5 = arith.constant 0 : index
    %c0_6 = arith.constant 0 : index
    %4 = vector.load %arg3[%c0_4, %c0_5, %c0_6] : memref<1x8x2xbf16, #tpu.memory_space<vmem>>, vector<1x8x2xbf16>
    %5 = vector.shape_cast %4 : vector<1x8x2xbf16> to vector<8x2xbf16>
    %6 = arith.extf %5 : vector<8x2xbf16> to vector<8x2xf32>
    %c32 = arith.constant 32 : index
    %c0_7 = arith.constant 0 : index
    %7 = vector.load %arg8[%c32, %c0_7] : memref<40x2xf32, #tpu.memory_space<vmem>>, vector<8x2xf32>
    tpu.vector_store %arg8[%c32, %c0_7], %6 {strides = array<i32>} : memref<40x2xf32, #tpu.memory_space<vmem>>, vector<8x2xf32>,
    %c0_8 = arith.constant 0 : index
    %c0_9 = arith.constant 0 : index
    %8 = vector.load %arg8[%c0_8, %c0_9] : memref<40x2xf32, #tpu.memory_space<vmem>>, vector<40x2xf32>
    %9 = vector.extract_strided_slice %8 {offsets = [0, 0], sizes = [32, 2], strides = [1, 1]} : vector<40x2xf32> to vector<32x2xf32>
    %10 = arith.truncf %9 : vector<32x2xf32> to vector<32x2xbf16>
    %c0_10 = arith.constant 0 : index
    %c0_11 = arith.constant 0 : index
    %c0_12 = arith.constant 0 : index
    %11 = vector.load %arg4[%c0_10, %c0_11, %c0_12] : memref<2x2x16xbf16, #tpu.memory_space<vmem>>, vector<1x2x16xbf16>
    %12 = vector.shape_cast %11 : vector<1x2x16xbf16> to vector<2x16xbf16>
    %cst = arith.constant dense<0.000000e+00> : vector<32x16xf32>
    %13 = tpu.matmul %10, %12, %cst {dimension_numbers = #tpu.dot_dimension_numbers<[1], [0], [0], [1], [0, 0, 1, 1], [], []>} : vector<32x2xbf16>, vector<2x16xbf16>, vector<32x16xf32> -> vector<32x16xf32>
    %14 = vector.extract_strided_slice %8 {offsets = [1, 0], sizes = [32, 2], strides = [1, 1]} : vector<40x2xf32> to vector<32x2xf32>
    %15 = arith.truncf %14 : vector<32x2xf32> to vector<32x2xbf16>
    %c1 = arith.constant 1 : index
    %c0_13 = arith.constant 0 : index
    %c0_14 = arith.constant 0 : index
    %16 = vector.load %arg4[%c1, %c0_13, %c0_14] : memref<2x2x16xbf16, #tpu.memory_space<vmem>>, vector<1x2x16xbf16>
    %17 = vector.shape_cast %16 : vector<1x2x16xbf16> to vector<2x16xbf16>
    %cst_15 = arith.constant dense<0.000000e+00> : vector<32x16xf32>
    %18 = tpu.matmul %15, %17, %cst_15 {dimension_numbers = #tpu.dot_dimension_numbers<[1], [0], [0], [1], [0, 0, 1, 1], [], []>} : vector<32x2xbf16>, vector<2x16xbf16>, vector<32x16xf32> -> vector<32x16xf32>
    %19 = arith.addf %13, %18 : vector<32x16xf32>
    %c32_i32 = arith.constant 32 : i32
    %20 = arith.muli %arg1, %c32_i32 : i32
    %21 = tpu.iota {dimensions = array<i32: 0>} : vector<32x1xi32>
    %22 = vector.broadcast %20 : i32 to vector<32x1xi32>
    %23 = arith.addi %22, %21 : vector<32x1xi32>
    %c31_i32 = arith.constant 31 : i32
    %24 = vector.broadcast %c31_i32 : i32 to vector<32x1xi32>
    %25 = arith.cmpi slt, %23, %24 : vector<32x1xi32>
    %cst_16 = arith.constant 0.000000e+00 : f32
    %26 = vector.shape_cast %25 : vector<32x1xi1> to vector<32x1xi1>
    %27 = vector.broadcast %26 : vector<32x1xi1> to vector<32x16xi1>
    %28 = vector.broadcast %cst_16 : f32 to vector<32x16xf32>
    %29 = arith.select %27, %19, %28 : vector<32x16xi1>, vector<32x16xf32>
    %30 = arith.truncf %29 : vector<32x16xf32> to vector<32x16xbf16>
    %c0_17 = arith.constant 0 : index
    %c0_18 = arith.constant 0 : index
    %c0_19 = arith.constant 0 : index
    %31 = vector.load %arg6[%c0_17, %c0_18, %c0_19] : memref<1x32x16xbf16, #tpu.memory_space<vmem>>, vector<1x32x16xbf16>
    %32 = vector.shape_cast %31 : vector<1x32x16xbf16> to vector<32x16xbf16>
    %33 = vector.shape_cast %30 : vector<32x16xbf16> to vector<1x32x16xbf16>
    tpu.vector_store %arg6[%c0_17, %c0_18, %c0_19], %33 {strides = array<i32>} : memref<1x32x16xbf16, #tpu.memory_space<vmem>>, vector<1x32x16xbf16>,
    %cst_20 = arith.constant dense<0.000000e+00> : vector<16xf32>
    %34 = vector.multi_reduction <add>, %29, %cst_20 [0] : vector<32x16xf32> to vector<16xf32>
    %35 = vector.shape_cast %34 : vector<16xf32> to vector<1x16xf32>
    %36 = arith.mulf %29, %29 : vector<32x16xf32>
    %cst_21 = arith.constant dense<0.000000e+00> : vector<16xf32>
    %37 = vector.multi_reduction <add>, %36, %cst_21 [0] : vector<32x16xf32> to vector<16xf32>
    %38 = vector.shape_cast %37 : vector<16xf32> to vector<1x16xf32>
    %39 = tpu.iota {dimensions = array<i32: 0>} : vector<8x1xi32>
    %c0_i32 = arith.constant 0 : i32
    %40 = vector.broadcast %c0_i32 : i32 to vector<8x1xi32>
    %41 = arith.cmpi eq, %39, %40 : vector<8x1xi32>
    %cst_22 = arith.constant 0.000000e+00 : f32
    %42 = vector.shape_cast %41 : vector<8x1xi1> to vector<8x1xi1>
    %43 = vector.broadcast %42 : vector<8x1xi1> to vector<8x16xi1>
    %44 = vector.shape_cast %35 : vector<1x16xf32> to vector<1x16xf32>
    %45 = vector.broadcast %44 : vector<1x16xf32> to vector<8x16xf32>
    %46 = vector.broadcast %cst_22 : f32 to vector<8x16xf32>
    %47 = arith.select %43, %45, %46 : vector<8x16xi1>, vector<8x16xf32>
    %c1_i32 = arith.constant 1 : i32
    %48 = vector.broadcast %c1_i32 : i32 to vector<8x1xi32>
    %49 = arith.cmpi eq, %39, %48 : vector<8x1xi32>
    %cst_23 = arith.constant 0.000000e+00 : f32
    %50 = vector.shape_cast %49 : vector<8x1xi1> to vector<8x1xi1>
    %51 = vector.broadcast %50 : vector<8x1xi1> to vector<8x16xi1>
    %52 = vector.shape_cast %38 : vector<1x16xf32> to vector<1x16xf32>
    %53 = vector.broadcast %52 : vector<1x16xf32> to vector<8x16xf32>
    %54 = vector.broadcast %cst_23 : f32 to vector<8x16xf32>
    %55 = arith.select %51, %53, %54 : vector<8x16xi1>, vector<8x16xf32>
    %56 = arith.addf %47, %55 : vector<8x16xf32>
    %c0_i32_24 = arith.constant 0 : i32
    %57 = arith.cmpi eq, %arg1, %c0_i32_24 : i32
    %58 = arith.extui %57 : i1 to i32
    %c0_i32_25 = arith.constant 0 : i32
    %59 = arith.cmpi ne, %58, %c0_i32_25 : i32
    scf.if %59 {
      %cst_32 = arith.constant 0.000000e+00 : f32
      %66 = vector.broadcast %cst_32 : f32 to vector<8x16xf32>
      %c0_33 = arith.constant 0 : index
      %c0_34 = arith.constant 0 : index
      %c0_35 = arith.constant 0 : index
      %67 = vector.load %arg7[%c0_33, %c0_34, %c0_35] : memref<1x8x16xf32, #tpu.memory_space<vmem>>, vector<1x8x16xf32>
      %68 = vector.shape_cast %67 : vector<1x8x16xf32> to vector<8x16xf32>
      %69 = vector.shape_cast %66 : vector<8x16xf32> to vector<1x8x16xf32>
      tpu.vector_store %arg7[%c0_33, %c0_34, %c0_35], %69 {strides = array<i32>} : memref<1x8x16xf32, #tpu.memory_space<vmem>>, vector<1x8x16xf32>,
    } else {
    }
    %c0_26 = arith.constant 0 : index
    %c0_27 = arith.constant 0 : index
    %c0_28 = arith.constant 0 : index
    %60 = vector.load %arg7[%c0_26, %c0_27, %c0_28] : memref<1x8x16xf32, #tpu.memory_space<vmem>>, vector<1x8x16xf32>
    %61 = vector.shape_cast %60 : vector<1x8x16xf32> to vector<8x16xf32>
    %62 = arith.addf %61, %56 : vector<8x16xf32>
    %c0_29 = arith.constant 0 : index
    %c0_30 = arith.constant 0 : index
    %c0_31 = arith.constant 0 : index
    %63 = vector.load %arg7[%c0_29, %c0_30, %c0_31] : memref<1x8x16xf32, #tpu.memory_space<vmem>>, vector<1x8x16xf32>
    %64 = vector.shape_cast %63 : vector<1x8x16xf32> to vector<8x16xf32>
    %65 = vector.shape_cast %62 : vector<8x16xf32> to vector<1x8x16xf32>
    tpu.vector_store %arg7[%c0_29, %c0_30, %c0_31], %65 {strides = array<i32>} : memref<1x8x16xf32, #tpu.memory_space<vmem>>, vector<1x8x16xf32>,
    return
  }
  func.func @transform_0(%arg0: i32, %arg1: i32) -> (i32, i32, i32) {
    %c0_i32 = arith.constant 0 : i32
    %c0_i32_0 = arith.constant 0 : i32
    return %arg0, %arg1, %c0_i32 : i32, i32, i32
  }
  func.func @transform_1(%arg0: i32, %arg1: i32) -> (i32, i32, i32) {
    %c1_i32 = arith.constant 1 : i32
    %0 = arith.addi %arg1, %c1_i32 : i32
    %c4_i32 = arith.constant 4 : i32
    %1 = arith.muli %0, %c4_i32 : i32
    %c0_i32 = arith.constant 0 : i32
    %c0_i32_0 = arith.constant 0 : i32
    return %arg0, %1, %c0_i32 : i32, i32, i32
  }
  func.func @transform_2(%arg0: i32, %arg1: i32) -> (i32, i32, i32) {
    %c0_i32 = arith.constant 0 : i32
    %c0_i32_0 = arith.constant 0 : i32
    %c0_i32_1 = arith.constant 0 : i32
    %c0_i32_2 = arith.constant 0 : i32
    return %c0_i32, %c0_i32_0, %c0_i32_1 : i32, i32, i32
  }
  func.func @transform_3(%arg0: i32, %arg1: i32) -> (i32, i32) {
    %c0_i32 = arith.constant 0 : i32
    %c0_i32_0 = arith.constant 0 : i32
    %c0_i32_1 = arith.constant 0 : i32
    return %c0_i32, %c0_i32_0 : i32, i32
  }
  func.func @transform_4(%arg0: i32, %arg1: i32) -> (i32, i32, i32) {
    %c0_i32 = arith.constant 0 : i32
    %c0_i32_0 = arith.constant 0 : i32
    return %arg0, %arg1, %c0_i32 : i32, i32, i32
  }
  func.func @transform_5(%arg0: i32, %arg1: i32) -> (i32, i32, i32) {
    %c0_i32 = arith.constant 0 : i32
    %c0_i32_0 = arith.constant 0 : i32
    %c0_i32_1 = arith.constant 0 : i32
    return %arg0, %c0_i32, %c0_i32_0 : i32, i32, i32
  }
}

module attributes {stable_mosaic.version = 11 : i64} {
  func.func @_conv_bn_stats_kernel(%arg0: i32, %arg1: i32, %arg2: memref<1x16x32xbf16, #tpu.memory_space<vmem>>, %arg3: memref<1x8x32xbf16, #tpu.memory_space<vmem>>, %arg4: memref<2x32x32xbf16, #tpu.memory_space<vmem>>, %arg5: memref<8x32xf32, #tpu.memory_space<vmem>>, %arg6: memref<1x16x32xf32, #tpu.memory_space<vmem>>, %arg7: memref<1x8x32xf32, #tpu.memory_space<vmem>>, %arg8: memref<24x32xf32, #tpu.memory_space<vmem>>) attributes {dimension_semantics = [#tpu.dimension_semantics<parallel>, #tpu.dimension_semantics<arbitrary>], iteration_bounds = array<i64: 2, 1>, scalar_prefetch = 0 : i64, scratch_operands = 1 : i64, tpu.core_type = #tpu.core_type<tc>, window_params = [{transform_indices = @transform_0, window_bounds = array<i64: 1, 16, 32>}, {transform_indices = @transform_1, window_bounds = array<i64: 1, 8, 32>}, {pipeline_mode = #tpu.pipeline_mode<synchronous>, transform_indices = @transform_2, window_bounds = array<i64: 2, 32, 32>}, {pipeline_mode = #tpu.pipeline_mode<synchronous>, transform_indices = @transform_3, window_bounds = array<i64: 8, 32>}, {transform_indices = @transform_4, window_bounds = array<i64: 1, 16, 32>}, {transform_indices = @transform_5, window_bounds = array<i64: 1, 8, 32>}]} {
    %c0 = arith.constant 0 : index
    %c0_0 = arith.constant 0 : index
    %c0_1 = arith.constant 0 : index
    %0 = vector.load %arg2[%c0, %c0_0, %c0_1] : memref<1x16x32xbf16, #tpu.memory_space<vmem>>, vector<1x16x32xbf16>
    %1 = vector.shape_cast %0 : vector<1x16x32xbf16> to vector<16x32xbf16>
    %2 = arith.extf %1 : vector<16x32xbf16> to vector<16x32xf32>
    %c0_2 = arith.constant 0 : index
    %c0_3 = arith.constant 0 : index
    %3 = vector.load %arg5[%c0_2, %c0_3] : memref<8x32xf32, #tpu.memory_space<vmem>>, vector<1x32xf32>
    %4 = vector.broadcast %3 : vector<1x32xf32> to vector<16x32xf32>
    %5 = arith.mulf %2, %4 : vector<16x32xf32>
    %c1 = arith.constant 1 : index
    %c0_4 = arith.constant 0 : index
    %6 = vector.load %arg5[%c1, %c0_4] : memref<8x32xf32, #tpu.memory_space<vmem>>, vector<1x32xf32>
    %7 = vector.broadcast %6 : vector<1x32xf32> to vector<16x32xf32>
    %8 = arith.addf %5, %7 : vector<16x32xf32>
    %cst = arith.constant 0.000000e+00 : f32
    %9 = vector.broadcast %cst : f32 to vector<16x32xf32>
    %10 = arith.cmpf ogt, %8, %9 : vector<16x32xf32>
    %cst_5 = arith.constant 0.00999999977 : f32
    %11 = vector.broadcast %cst_5 : f32 to vector<16x32xf32>
    %12 = arith.mulf %11, %8 : vector<16x32xf32>
    %13 = arith.select %10, %8, %12 : vector<16x32xi1>, vector<16x32xf32>
    %c0_6 = arith.constant 0 : index
    %c0_7 = arith.constant 0 : index
    %14 = vector.load %arg8[%c0_6, %c0_7] : memref<24x32xf32, #tpu.memory_space<vmem>>, vector<16x32xf32>
    tpu.vector_store %arg8[%c0_6, %c0_7], %13 {strides = array<i32>} : memref<24x32xf32, #tpu.memory_space<vmem>>, vector<16x32xf32>,
    %c0_8 = arith.constant 0 : index
    %c0_9 = arith.constant 0 : index
    %c0_10 = arith.constant 0 : index
    %15 = vector.load %arg3[%c0_8, %c0_9, %c0_10] : memref<1x8x32xbf16, #tpu.memory_space<vmem>>, vector<1x8x32xbf16>
    %16 = vector.shape_cast %15 : vector<1x8x32xbf16> to vector<8x32xbf16>
    %17 = arith.extf %16 : vector<8x32xbf16> to vector<8x32xf32>
    %c0_11 = arith.constant 0 : index
    %c0_12 = arith.constant 0 : index
    %18 = vector.load %arg5[%c0_11, %c0_12] : memref<8x32xf32, #tpu.memory_space<vmem>>, vector<1x32xf32>
    %19 = vector.broadcast %18 : vector<1x32xf32> to vector<8x32xf32>
    %20 = arith.mulf %17, %19 : vector<8x32xf32>
    %c1_13 = arith.constant 1 : index
    %c0_14 = arith.constant 0 : index
    %21 = vector.load %arg5[%c1_13, %c0_14] : memref<8x32xf32, #tpu.memory_space<vmem>>, vector<1x32xf32>
    %22 = vector.broadcast %21 : vector<1x32xf32> to vector<8x32xf32>
    %23 = arith.addf %20, %22 : vector<8x32xf32>
    %cst_15 = arith.constant 0.000000e+00 : f32
    %24 = vector.broadcast %cst_15 : f32 to vector<8x32xf32>
    %25 = arith.cmpf ogt, %23, %24 : vector<8x32xf32>
    %cst_16 = arith.constant 0.00999999977 : f32
    %26 = vector.broadcast %cst_16 : f32 to vector<8x32xf32>
    %27 = arith.mulf %26, %23 : vector<8x32xf32>
    %28 = arith.select %25, %23, %27 : vector<8x32xi1>, vector<8x32xf32>
    %c16 = arith.constant 16 : index
    %c0_17 = arith.constant 0 : index
    %29 = vector.load %arg8[%c16, %c0_17] : memref<24x32xf32, #tpu.memory_space<vmem>>, vector<8x32xf32>
    tpu.vector_store %arg8[%c16, %c0_17], %28 {strides = array<i32>} : memref<24x32xf32, #tpu.memory_space<vmem>>, vector<8x32xf32>,
    %c0_18 = arith.constant 0 : index
    %c0_19 = arith.constant 0 : index
    %30 = vector.load %arg8[%c0_18, %c0_19] : memref<24x32xf32, #tpu.memory_space<vmem>>, vector<24x32xf32>
    %31 = vector.extract_strided_slice %30 {offsets = [0, 0], sizes = [16, 32], strides = [1, 1]} : vector<24x32xf32> to vector<16x32xf32>
    %32 = arith.truncf %31 : vector<16x32xf32> to vector<16x32xbf16>
    %c0_20 = arith.constant 0 : index
    %c0_21 = arith.constant 0 : index
    %c0_22 = arith.constant 0 : index
    %33 = vector.load %arg4[%c0_20, %c0_21, %c0_22] : memref<2x32x32xbf16, #tpu.memory_space<vmem>>, vector<1x32x32xbf16>
    %34 = vector.shape_cast %33 : vector<1x32x32xbf16> to vector<32x32xbf16>
    %cst_23 = arith.constant dense<0.000000e+00> : vector<16x32xf32>
    %35 = tpu.matmul %32, %34, %cst_23 {dimension_numbers = #tpu.dot_dimension_numbers<[1], [0], [0], [1], [0, 0, 1, 1], [], []>} : vector<16x32xbf16>, vector<32x32xbf16>, vector<16x32xf32> -> vector<16x32xf32>
    %36 = vector.extract_strided_slice %30 {offsets = [1, 0], sizes = [16, 32], strides = [1, 1]} : vector<24x32xf32> to vector<16x32xf32>
    %37 = arith.truncf %36 : vector<16x32xf32> to vector<16x32xbf16>
    %c1_24 = arith.constant 1 : index
    %c0_25 = arith.constant 0 : index
    %c0_26 = arith.constant 0 : index
    %38 = vector.load %arg4[%c1_24, %c0_25, %c0_26] : memref<2x32x32xbf16, #tpu.memory_space<vmem>>, vector<1x32x32xbf16>
    %39 = vector.shape_cast %38 : vector<1x32x32xbf16> to vector<32x32xbf16>
    %cst_27 = arith.constant dense<0.000000e+00> : vector<16x32xf32>
    %40 = tpu.matmul %37, %39, %cst_27 {dimension_numbers = #tpu.dot_dimension_numbers<[1], [0], [0], [1], [0, 0, 1, 1], [], []>} : vector<16x32xbf16>, vector<32x32xbf16>, vector<16x32xf32> -> vector<16x32xf32>
    %41 = arith.addf %35, %40 : vector<16x32xf32>
    %c16_i32 = arith.constant 16 : i32
    %42 = arith.muli %arg1, %c16_i32 : i32
    %43 = tpu.iota {dimensions = array<i32: 0>} : vector<16x1xi32>
    %44 = vector.broadcast %42 : i32 to vector<16x1xi32>
    %45 = arith.addi %44, %43 : vector<16x1xi32>
    %c15_i32 = arith.constant 15 : i32
    %46 = vector.broadcast %c15_i32 : i32 to vector<16x1xi32>
    %47 = arith.cmpi slt, %45, %46 : vector<16x1xi32>
    %cst_28 = arith.constant 0.000000e+00 : f32
    %48 = vector.shape_cast %47 : vector<16x1xi1> to vector<16x1xi1>
    %49 = vector.broadcast %48 : vector<16x1xi1> to vector<16x32xi1>
    %50 = vector.broadcast %cst_28 : f32 to vector<16x32xf32>
    %51 = arith.select %49, %41, %50 : vector<16x32xi1>, vector<16x32xf32>
    %c0_29 = arith.constant 0 : index
    %c0_30 = arith.constant 0 : index
    %c0_31 = arith.constant 0 : index
    %52 = vector.load %arg6[%c0_29, %c0_30, %c0_31] : memref<1x16x32xf32, #tpu.memory_space<vmem>>, vector<1x16x32xf32>
    %53 = vector.shape_cast %52 : vector<1x16x32xf32> to vector<16x32xf32>
    %54 = vector.shape_cast %51 : vector<16x32xf32> to vector<1x16x32xf32>
    tpu.vector_store %arg6[%c0_29, %c0_30, %c0_31], %54 {strides = array<i32>} : memref<1x16x32xf32, #tpu.memory_space<vmem>>, vector<1x16x32xf32>,
    %cst_32 = arith.constant dense<0.000000e+00> : vector<32xf32>
    %55 = vector.multi_reduction <add>, %51, %cst_32 [0] : vector<16x32xf32> to vector<32xf32>
    %56 = vector.shape_cast %55 : vector<32xf32> to vector<1x32xf32>
    %57 = arith.mulf %51, %51 : vector<16x32xf32>
    %cst_33 = arith.constant dense<0.000000e+00> : vector<32xf32>
    %58 = vector.multi_reduction <add>, %57, %cst_33 [0] : vector<16x32xf32> to vector<32xf32>
    %59 = vector.shape_cast %58 : vector<32xf32> to vector<1x32xf32>
    %60 = tpu.iota {dimensions = array<i32: 0>} : vector<8x1xi32>
    %c0_i32 = arith.constant 0 : i32
    %61 = vector.broadcast %c0_i32 : i32 to vector<8x1xi32>
    %62 = arith.cmpi eq, %60, %61 : vector<8x1xi32>
    %cst_34 = arith.constant 0.000000e+00 : f32
    %63 = vector.shape_cast %62 : vector<8x1xi1> to vector<8x1xi1>
    %64 = vector.broadcast %63 : vector<8x1xi1> to vector<8x32xi1>
    %65 = vector.shape_cast %56 : vector<1x32xf32> to vector<1x32xf32>
    %66 = vector.broadcast %65 : vector<1x32xf32> to vector<8x32xf32>
    %67 = vector.broadcast %cst_34 : f32 to vector<8x32xf32>
    %68 = arith.select %64, %66, %67 : vector<8x32xi1>, vector<8x32xf32>
    %c1_i32 = arith.constant 1 : i32
    %69 = vector.broadcast %c1_i32 : i32 to vector<8x1xi32>
    %70 = arith.cmpi eq, %60, %69 : vector<8x1xi32>
    %cst_35 = arith.constant 0.000000e+00 : f32
    %71 = vector.shape_cast %70 : vector<8x1xi1> to vector<8x1xi1>
    %72 = vector.broadcast %71 : vector<8x1xi1> to vector<8x32xi1>
    %73 = vector.shape_cast %59 : vector<1x32xf32> to vector<1x32xf32>
    %74 = vector.broadcast %73 : vector<1x32xf32> to vector<8x32xf32>
    %75 = vector.broadcast %cst_35 : f32 to vector<8x32xf32>
    %76 = arith.select %72, %74, %75 : vector<8x32xi1>, vector<8x32xf32>
    %77 = arith.addf %68, %76 : vector<8x32xf32>
    %c0_i32_36 = arith.constant 0 : i32
    %78 = arith.cmpi eq, %arg1, %c0_i32_36 : i32
    %79 = arith.extui %78 : i1 to i32
    %c0_i32_37 = arith.constant 0 : i32
    %80 = arith.cmpi ne, %79, %c0_i32_37 : i32
    scf.if %80 {
      %cst_44 = arith.constant 0.000000e+00 : f32
      %87 = vector.broadcast %cst_44 : f32 to vector<8x32xf32>
      %c0_45 = arith.constant 0 : index
      %c0_46 = arith.constant 0 : index
      %c0_47 = arith.constant 0 : index
      %88 = vector.load %arg7[%c0_45, %c0_46, %c0_47] : memref<1x8x32xf32, #tpu.memory_space<vmem>>, vector<1x8x32xf32>
      %89 = vector.shape_cast %88 : vector<1x8x32xf32> to vector<8x32xf32>
      %90 = vector.shape_cast %87 : vector<8x32xf32> to vector<1x8x32xf32>
      tpu.vector_store %arg7[%c0_45, %c0_46, %c0_47], %90 {strides = array<i32>} : memref<1x8x32xf32, #tpu.memory_space<vmem>>, vector<1x8x32xf32>,
    } else {
    }
    %c0_38 = arith.constant 0 : index
    %c0_39 = arith.constant 0 : index
    %c0_40 = arith.constant 0 : index
    %81 = vector.load %arg7[%c0_38, %c0_39, %c0_40] : memref<1x8x32xf32, #tpu.memory_space<vmem>>, vector<1x8x32xf32>
    %82 = vector.shape_cast %81 : vector<1x8x32xf32> to vector<8x32xf32>
    %83 = arith.addf %82, %77 : vector<8x32xf32>
    %c0_41 = arith.constant 0 : index
    %c0_42 = arith.constant 0 : index
    %c0_43 = arith.constant 0 : index
    %84 = vector.load %arg7[%c0_41, %c0_42, %c0_43] : memref<1x8x32xf32, #tpu.memory_space<vmem>>, vector<1x8x32xf32>
    %85 = vector.shape_cast %84 : vector<1x8x32xf32> to vector<8x32xf32>
    %86 = vector.shape_cast %83 : vector<8x32xf32> to vector<1x8x32xf32>
    tpu.vector_store %arg7[%c0_41, %c0_42, %c0_43], %86 {strides = array<i32>} : memref<1x8x32xf32, #tpu.memory_space<vmem>>, vector<1x8x32xf32>,
    return
  }
  func.func @transform_0(%arg0: i32, %arg1: i32) -> (i32, i32, i32) {
    %c0_i32 = arith.constant 0 : i32
    %c0_i32_0 = arith.constant 0 : i32
    return %arg0, %arg1, %c0_i32 : i32, i32, i32
  }
  func.func @transform_1(%arg0: i32, %arg1: i32) -> (i32, i32, i32) {
    %c1_i32 = arith.constant 1 : i32
    %0 = arith.addi %arg1, %c1_i32 : i32
    %c2_i32 = arith.constant 2 : i32
    %1 = arith.muli %0, %c2_i32 : i32
    %c0_i32 = arith.constant 0 : i32
    %c0_i32_0 = arith.constant 0 : i32
    return %arg0, %1, %c0_i32 : i32, i32, i32
  }
  func.func @transform_2(%arg0: i32, %arg1: i32) -> (i32, i32, i32) {
    %c0_i32 = arith.constant 0 : i32
    %c0_i32_0 = arith.constant 0 : i32
    %c0_i32_1 = arith.constant 0 : i32
    %c0_i32_2 = arith.constant 0 : i32
    return %c0_i32, %c0_i32_0, %c0_i32_1 : i32, i32, i32
  }
  func.func @transform_3(%arg0: i32, %arg1: i32) -> (i32, i32) {
    %c0_i32 = arith.constant 0 : i32
    %c0_i32_0 = arith.constant 0 : i32
    %c0_i32_1 = arith.constant 0 : i32
    return %c0_i32, %c0_i32_0 : i32, i32
  }
  func.func @transform_4(%arg0: i32, %arg1: i32) -> (i32, i32, i32) {
    %c0_i32 = arith.constant 0 : i32
    %c0_i32_0 = arith.constant 0 : i32
    return %arg0, %arg1, %c0_i32 : i32, i32, i32
  }
  func.func @transform_5(%arg0: i32, %arg1: i32) -> (i32, i32, i32) {
    %c0_i32 = arith.constant 0 : i32
    %c0_i32_0 = arith.constant 0 : i32
    %c0_i32_1 = arith.constant 0 : i32
    return %arg0, %c0_i32, %c0_i32_0 : i32, i32, i32
  }
}

module attributes {stable_mosaic.version = 11 : i64} {
  func.func @_bn_lrelu_kernel(%arg0: i32, %arg1: i32, %arg2: memref<1x16x32xf32, #tpu.memory_space<vmem>>, %arg3: memref<8x32xf32, #tpu.memory_space<vmem>>, %arg4: memref<1x16x32xf32, #tpu.memory_space<vmem>>) attributes {dimension_semantics = [#tpu.dimension_semantics<parallel>, #tpu.dimension_semantics<parallel>], iteration_bounds = array<i64: 2, 1>, scalar_prefetch = 0 : i64, scratch_operands = 0 : i64, tpu.core_type = #tpu.core_type<tc>, window_params = [{transform_indices = @transform_0, window_bounds = array<i64: 1, 16, 32>}, {pipeline_mode = #tpu.pipeline_mode<synchronous>, transform_indices = @transform_1, window_bounds = array<i64: 8, 32>}, {transform_indices = @transform_2, window_bounds = array<i64: 1, 16, 32>}]} {
    %c0 = arith.constant 0 : index
    %c0_0 = arith.constant 0 : index
    %c0_1 = arith.constant 0 : index
    %0 = vector.load %arg2[%c0, %c0_0, %c0_1] : memref<1x16x32xf32, #tpu.memory_space<vmem>>, vector<1x16x32xf32>
    %1 = vector.shape_cast %0 : vector<1x16x32xf32> to vector<16x32xf32>
    %c0_2 = arith.constant 0 : index
    %c0_3 = arith.constant 0 : index
    %2 = vector.load %arg3[%c0_2, %c0_3] : memref<8x32xf32, #tpu.memory_space<vmem>>, vector<1x32xf32>
    %3 = vector.broadcast %2 : vector<1x32xf32> to vector<16x32xf32>
    %4 = arith.mulf %1, %3 : vector<16x32xf32>
    %c1 = arith.constant 1 : index
    %c0_4 = arith.constant 0 : index
    %5 = vector.load %arg3[%c1, %c0_4] : memref<8x32xf32, #tpu.memory_space<vmem>>, vector<1x32xf32>
    %6 = vector.broadcast %5 : vector<1x32xf32> to vector<16x32xf32>
    %7 = arith.addf %4, %6 : vector<16x32xf32>
    %cst = arith.constant 0.000000e+00 : f32
    %8 = vector.broadcast %cst : f32 to vector<16x32xf32>
    %9 = arith.cmpf ogt, %7, %8 : vector<16x32xf32>
    %cst_5 = arith.constant 0.00999999977 : f32
    %10 = vector.broadcast %cst_5 : f32 to vector<16x32xf32>
    %11 = arith.mulf %10, %7 : vector<16x32xf32>
    %12 = arith.select %9, %7, %11 : vector<16x32xi1>, vector<16x32xf32>
    %c0_6 = arith.constant 0 : index
    %c0_7 = arith.constant 0 : index
    %c0_8 = arith.constant 0 : index
    %13 = vector.load %arg4[%c0_6, %c0_7, %c0_8] : memref<1x16x32xf32, #tpu.memory_space<vmem>>, vector<1x16x32xf32>
    %14 = vector.shape_cast %13 : vector<1x16x32xf32> to vector<16x32xf32>
    %15 = vector.shape_cast %12 : vector<16x32xf32> to vector<1x16x32xf32>
    tpu.vector_store %arg4[%c0_6, %c0_7, %c0_8], %15 {strides = array<i32>} : memref<1x16x32xf32, #tpu.memory_space<vmem>>, vector<1x16x32xf32>,
    return
  }
  func.func @transform_0(%arg0: i32, %arg1: i32) -> (i32, i32, i32) {
    %c0_i32 = arith.constant 0 : i32
    %c0_i32_0 = arith.constant 0 : i32
    return %arg0, %arg1, %c0_i32 : i32, i32, i32
  }
  func.func @transform_1(%arg0: i32, %arg1: i32) -> (i32, i32) {
    %c0_i32 = arith.constant 0 : i32
    %c0_i32_0 = arith.constant 0 : i32
    %c0_i32_1 = arith.constant 0 : i32
    return %c0_i32, %c0_i32_0 : i32, i32
  }
  func.func @transform_2(%arg0: i32, %arg1: i32) -> (i32, i32, i32) {
    %c0_i32 = arith.constant 0 : i32
    %c0_i32_0 = arith.constant 0 : i32
    return %arg0, %arg1, %c0_i32 : i32, i32, i32
  }
}

</mosaic_0001>

<bundles_post_ra>
// kernel: tile.13
= control target key start
LH: loop header
LB: loop body
LE: loop exit
PB: predicated region body
PF: predicated region fallthrough
CT: control target
= control target key end

     0   :  { %s22_s0 = inlined_call_operand.vmem [shape: f32[16], index: 0, kind: input, shape index: {}]   ;;  %s23_s1 = inlined_call_operand.vmem [shape: f32[2,16], index: 1, kind: output, shape index: {}]  }
   0x1   :  { %v4_v0 = vld [vmem:[%s22_s0] ss:$0 sm:$0xff] }
   0x2   :  { %5 = vst [vmem:[%s23_s1] sm:$0x3] %v4_v0 }

// kernel: a_call__.5
= control target key start
LH: loop header
LB: loop body
LE: loop exit
PB: predicated region body
PF: predicated region fallthrough
CT: control target
= control target key end

     0   :  { %s373_s9 = smov 0   ;;  %s375_s10 = smov 0   ;;  %s409_s0 = inlined_call_operand.vmem [shape: f32[2,16,32], index: 0, kind: input, shape index: {}]   ;;  %s410_s1 = inlined_call_operand.vmem [shape: f32[8,32], index: 1, kind: input, shape index: {}]   ;;  %s411_s2 = inlined_call_operand.vmem [shape: f32[2,16,32], index: 2, kind: output, shape index: {}]  }
   0x1   :  { %s377_s11 = smov 0  }
   0x2 LB: > { %s24_s12 = sadd.s32 1, %s352_s10  ;;  %p299_p0 = scmp.ge.s32.totalorder %s356_s11, 1  ;;  %s356_s11 = sphi %s377_s11, %s12_s11   ;;  %s352_s10 = sphi %s375_s10, %s413_s10   ;;  %s348_s9 = sphi %s373_s9, %s412_s9  }
   0x3   : > { %p26_p1 = scmp.ge.s32.totalorder %s24_s12, 2  ;;  %p133_p2 = scmp.lt.s32.totalorder %s356_s11, 3 }
   0x5   : > { %s415_s12 = smov (%p26_p1, %s24_s12), 0  ;;  %p134_p3 = pnand %p299_p0, %p133_p2 }
   0x6   : > { %p164_p4 = scmp.lt.s32.totalorder (!%p134_p3), %s348_s9, 1 }
   0x7   : > { %137 = sbr.rel (%p134_p3) target bundleno = 24 (0x18), region = 28 }
   0xc   : > { %s417_s9 = smov (!%p164_p4, %s348_s9), 1  ;;  %v304_v0 = vld [vmem:[%s410_s1] ss:$0 sm:$0xff]  ;;  %v305_v3 = vld [vmem:[%s410_s1 + $0x1] ss:$0 sm:$0xff]  ;;  %vm205_vm0 = vcmask 261120  }
   0xd   : > { %s308_s13 = sshll.u32 %s417_s9, 4 }
   0xe   : > { %s171_s18 = scalar_lea.vmem %s409_s0, %s308_s13  ;;  %s181_s23 = scalar_lea.vmem %s411_s2, %s308_s13 }
   0xf   : > { %v183_v1 = vld [vmem:[%s171_s18] sm:$0xff]  ;;  %v184_v2 = vld [vmem:[%s171_s18 + $0x8] sm:$0xff] }
  0x10   : > { %v190_v4 = vmul.f32 %v304_v0, %v183_v1  ;;  %v191_v5 = vmul.f32 %v304_v0, %v184_v2 }
  0x12   : > { %v197_v6 = vadd.f32 %v305_v3, %v190_v4  ;;  %v198_v7 = vadd.f32 %v305_v3, %v191_v5 }
  0x14   : > { %vm199_vm1 = vcmp.gt.f32.partialorder %v197_v6, 0.0  ;;  %v201_v8 = vmul.f32 0.01, %v197_v6  ;;  %vm200_vm2 = vcmp.gt.f32.partialorder %v198_v7, 0.0  ;;  %v202_v9 = vmul.f32 0.01, %v198_v7 }
  0x16   : > { %v203_v10 = vsel %vm199_vm1, %v197_v6, %v201_v8  ;;  %v204_v11 = vsel %vm200_vm2, %v198_v7, %v202_v9 }
  0x17   : > { %206 = vst.msk [vmem:[%s181_s23] sm:$0xff] %vm205_vm0, %v203_v10  ;;  %207 = vst.msk [vmem:[%s181_s23 + $0x8] sm:$0xff] %vm205_vm0, %v204_v11 }
  0x18 PF: > { %s12_s11 = sadd.s32 1, %s356_s11   ;;  %s412_s9 = smov %s352_s10 }
  0x19   : > { %p9_p5 = scmp.ge.s32.totalorder %s12_s11, 4   ;;  %s413_s10 = smov %s415_s12 }
  0x1b   :  { %11 = sbr.rel (!%p9_p5) target bundleno = 2 (0x2), region = 58 }

// kernel: a_call__.4
= control target key start
LH: loop header
LB: loop body
LE: loop exit
PB: predicated region body
PF: predicated region fallthrough
CT: control target
= control target key end

     0   :  { %s858_s18 = smov 0   ;;  %s860_s19 = smov 0   ;;  %s945_s0 = inlined_call_operand.vmem [shape: bf16[2,24,32], index: 0, kind: input, shape index: {}, may-alias: {0,1}]   ;;  %s946_s1 = inlined_call_operand.vmem [shape: bf16[2,24,32], index: 1, kind: input, shape index: {}, may-alias: {0,1}]   ;;  %s947_s2 = inlined_call_operand.vmem [shape: bf16[2,32,32], index: 2, kind: input, shape index: {}]   ;;  %s948_s3 = inlined_call_operand.vmem [shape: f32[8,32], index: 3, kind: input, shape index: {}]   ;;  %s949_s4 = inlined_call_operand.vmem [shape: f32[2,16,32], index: 4, kind: output, shape index: {0}]   ;;  %s950_s5 = inlined_call_operand.vmem [shape: f32[2,8,32], index: 5, kind: output, shape index: {1}]  }
   0x1   :  { %s862_s20 = smov 0  }
   0x2 LB: > { %s28_s21 = sadd.s32 1, %s820_s19  ;;  %p718_p0 = scmp.ge.s32.totalorder %s824_s20, 1  ;;  %s824_s20 = sphi %s862_s20, %s16_s20   ;;  %s820_s19 = sphi %s860_s19, %s952_s19   ;;  %s816_s18 = sphi %s858_s18, %s951_s18  }
   0x3   : > { %p30_p1 = scmp.ge.s32.totalorder %s28_s21, 2  ;;  %p242_p2 = scmp.lt.s32.totalorder %s824_s20, 3 }
   0x5   : > { %s954_s21 = smov (%p30_p1, %s28_s21), 0  ;;  %p243_p3 = pnand %p718_p0, %p242_p2 }
   0x6   : > { %p301_p4 = scmp.lt.s32.totalorder (!%p243_p3), %s816_s18, 1 }
   0x7   : > { %246 = sbr.rel (%p243_p3) target bundleno = 266 (0x10a), region = 36 }
   0xc   : > { %v798_v0 = vld [vmem:[%s947_s2 + $0x8] sm:$0xff]   ;;  %v826_v1 = vmov 0.0   ;;  %v799_v2 = vld [vmem:[%s947_s2] sm:$0xff]   ;;  %v800_v3 = vld [vmem:[%s947_s2 + $0x18] sm:$0xff]   ;;  %vm827_vm0 = vmmov 0   ;;  %s956_s18 = smov (!%p301_p4, %s816_s18), 1  ;;  %v525_v36 = vlaneseq }
   0xd   : > { %761 = vmatprep.subr.bf16.mxu1 %v826_v1  ;;  %753 = vmatprep.subr.bf16.mxu0 %v826_v1  ;;  %v801_v4 = vld [vmem:[%s947_s2 + $0x10] sm:$0xff]   ;;  %s769_s30 = smul.u32 12, %s956_s18  ;;  %v724_v6 = vld [vmem:[%s948_s3] ss:$0 sm:$0xff]  ;;  %v725_v10 = vld [vmem:[%s948_s3 + $0x1] ss:$0 sm:$0xff] }
   0xe   : > { %762 = vmatpush3.bf16.msra.mxu1 %v798_v0  ;;  %765 = vmatprep.mubr.msk.bf16.mxu1 %vm827_vm0, %v826_v1  ;;  %vm365_vm1 = vcmask 261120   ;;  %vm400_vm5 = vsmask.f32 7424  ;;  %s723_s17 = sshll.u32 %s956_s18, 3  ;;  %v526_v39 = vshrl.u32 %v525_v36, 7  ;;  %s742_s25 = sshll.u32 %s956_s18, 4 }
   0xf   : > { %763 = vmatprep.subr.bf16.mxu1 %v826_v1  ;;  %757 = vmatprep.mubr.msk.bf16.mxu0 %vm827_vm0, %v826_v1  ;;  %s308_s8 = scalar_lea.vmem %s945_s0, %s769_s30  ;;  %s741_s9 = sadd.s32 8, %s769_s30 }
  0x10   : > { %754 = vmatpush3.bf16.msra.mxu0 %v800_v3  ;;  %v744_v5 = vld [vmem:[%s308_s8] sm:$0xff]   ;;  %s323_s14 = scalar_lea.vmem %s946_s1, %s741_s9  ;;  %s918_s24 = scalar_lea.vmem %s950_s5, %s723_s17  ;;  %v527_v43 = vadd.s32 8, %v526_v39  ;;  %vm561_vm7 = vcmp.eq.s32.totalorder %v526_v39, 0  ;;  %vm565_vm8 = vcmp.eq.s32.totalorder %v526_v39, 1 }
  0x11   : > { %755 = vmatprep.subr.bf16.mxu0 %v826_v1  ;;  %v745_v7 = vunpack.c.l.bf16 %v744_v5  ;;  %v746_v8 = vunpack.c.h.bf16 %v744_v5  ;;  %v368_v9 = vld [vmem:[%s323_s14] sm:$0xf]  ;;  %574 = vst.msk [vmem:[%s918_s24] sm:$0xff] %vm365_vm1, %v826_v1  ;;  %s334_s28 = scalar_lea.vmem %s949_s4, %s742_s25 }
  0x12   : > { %764 = vmatpush3.bf16.msra.mxu1 %v799_v2  ;;  %v369_v11 = vunpack.c.l.bf16 %v368_v9  ;;  %vm532_vm6 = vcmp.lt.s32.totalorder %v527_v43, 15 }
  0x13   : > { %v350_v12 = vmul.f32 %v745_v7, %v724_v6  ;;  %v351_v13 = vmul.f32 %v746_v8, %v724_v6 }
  0x14   : > { %756 = vmatpush3.bf16.msra.mxu0 %v801_v4  ;;  %v375_v14 = vmul.f32 %v724_v6, %v369_v11 }
  0x15   : > { %v357_v15 = vadd.f32 %v725_v10, %v350_v12  ;;  %v358_v16 = vadd.f32 %v725_v10, %v351_v13 }
  0x16   : > { %v381_v17 = vadd.f32 %v725_v10, %v375_v14 }
  0x17   : > { %vm359_vm2 = vcmp.gt.f32.partialorder %v357_v15, 0.0  ;;  %vm360_vm3 = vcmp.gt.f32.partialorder %v358_v16, 0.0  ;;  %v361_v18 = vmul.f32 0.01, %v357_v15  ;;  %v362_v19 = vmul.f32 0.01, %v358_v16 }
  0x18   : > { %vm382_vm4 = vcmp.gt.f32.partialorder %v381_v17, 0.0  ;;  %v383_v20 = vmul.f32 0.01, %v381_v17  ;;  %v575_v8 = vld [vmem:[%s918_s24] sm:$0xff] }
  0x19   : > { %v363_v21 = vsel %vm359_vm2, %v357_v15, %v361_v18  ;;  %v364_v22 = vsel %vm360_vm3, %v358_v16, %v362_v19 }
  0x1a   : > { %366 = vst.msk [vmem:[#allocation2] sm:$0xff] %vm365_vm1, %v363_v21  ;;  %367 = vst.msk [vmem:[#allocation2 + $0x8] sm:$0xff] %vm365_vm1, %v364_v22  ;;  %v384_v23 = vsel %vm382_vm4, %v381_v17, %v383_v20 }
  0x1b   : > { %385 = vst.msk [vmem:[#allocation2 + $0x10] sm:$0xff] %vm365_vm1, %v384_v23 }
  0x21   : > { %v386_v24 = vld [vmem:[#allocation2] sm:$0xff]  ;;  %v387_v25 = vld [vmem:[#allocation2 + $0x8] sm:$0xff] }
  0x22   : > { %v389_v26 = vpack.c.bf16 %v387_v25, %v386_v24  ;;  %v388_v27 = vld [vmem:[#allocation2 + $0x10] sm:$0xff] }
  0x23   : > { %v394_v28 = vpack.c.bf16 %v388_v27, %v388_v27 }
  0x24   : > { %766 = vmatmul.mubr.msk.bf16.vlgmr.msra.gmra.mxu1 %vm365_vm1, %v389_v26  ;;  %v402_v29 = vshrl.u32 %v389_v26, 16  ;;  %v404_v30 = vshll.u32 %v389_v26, 16 }
  0x25   : > { %v409_v31 = vshll.u32 %v394_v28, 16 }
  0x26   : > { %v406_v32 = vrot.slane %v404_v30, 1 }
  0x27   : > { %v411_v33 = vrot.slane %v409_v31, 1 }
  0x28   : > { %v407_v34 = vor.u32 %v406_v32, %v402_v29 }
  0x2a   : > { %v412_v35 = vsel %vm400_vm5, %v407_v34, %v411_v33 }
  0x2b   : > { %758 = vmatmul.mubr.msk.bf16.vlgmr.msra.gmra.mxu0 %vm365_vm1, %v412_v35 }
  0xe4   : > { %v517_v37 = vpop.f32.mrf.mxu1 }
  0xe6   : > { %v767_v38 = vpop.f32.mrf.mxu1 }
  0xe8   : > { %v520_v40 = vpop.f32.mrf.mxu1 }
  0xea   : > { %v768_v41 = vpop.f32.mrf.mxu1 }
  0xeb   : > { %v462_v42 = vpop.f32.mrf.mxu0 }
  0xec   : > { %v518_v44 = vadd.f32 %v517_v37, %v462_v42 }
  0xed   : > { %v759_v45 = vpop.f32.mrf.mxu0 }
  0xee   : > { %539 = vst.msk [vmem:[%s334_s28] sm:$0xff] %vm365_vm1, %v518_v44  ;;  %v550_v48 = vmul.f32 %v518_v44, %v518_v44  ;;  %v541_v51 = vsel %vm365_vm1, %v518_v44, 0.0 }
  0xef   : > { %v465_v46 = vpop.f32.mrf.mxu0 }
  0xf0   : > { %v521_v47 = vadd.f32 %v520_v40, %v465_v46  ;;  %v552_v55 = vsel %vm365_vm1, %v550_v48, 0.0 }
  0xf1   : > { %v760_v49 = vpop.f32.mrf.mxu0 }
  0xf2   : > { %v538_v50 = vsel %vm532_vm6, %v521_v47, 0.0 }
  0xf3   : > { %540 = vst.msk [vmem:[%s334_s28 + $0x8] sm:$0xff] %vm365_vm1, %v538_v50  ;;  %v542_v52 = vsel %vm365_vm1, %v538_v50, 0.0  ;;  %v551_v53 = vmul.f32 %v538_v50, %v538_v50 }
  0xf4   : > { %v543_v54 = vadd.f32 %v542_v52, %v541_v51 }
  0xf5   : > { %v553_v56 = vsel %vm365_vm1, %v551_v53, 0.0 }
  0xf6   : > { %v544_v57 = vrot.slane %v543_v54, 4  ;;  %v554_v58 = vadd.f32 %v553_v56, %v552_v55 }
  0xf8   : > { %v545_v59 = vadd.f32 %v544_v57, %v543_v54  ;;  %v555_v60 = vrot.slane %v554_v58, 4 }
  0xfa   : > { %v546_v61 = vrot.slane %v545_v59, 2  ;;  %v556_v62 = vadd.f32 %v555_v60, %v554_v58 }
  0xfc   : > { %v547_v63 = vadd.f32 %v546_v61, %v545_v59  ;;  %v557_v0 = vrot.slane %v556_v62, 2 }
  0xfe   : > { %v548_v1 = vrot.slane %v547_v63, 1  ;;  %v558_v2 = vadd.f32 %v557_v0, %v556_v62 }
 0x100   : > { %v549_v3 = vadd.f32 %v548_v1, %v547_v63  ;;  %v559_v4 = vrot.slane %v558_v2, 1 }
 0x102   : > { %v560_v5 = vadd.f32 %v559_v4, %v558_v2  ;;  %v564_v6 = vsel %vm561_vm7, %v549_v3, 0.0 }
 0x104   : > { %v568_v7 = vsel %vm565_vm8, %v560_v5, 0.0 }
 0x105   : > { %v569_v9 = vadd.f32 %v568_v7, %v564_v6 }
 0x107   : > { %v576_v10 = vadd.f32 %v575_v8, %v569_v9 }
 0x109   : > { %577 = vst.msk [vmem:[%s918_s24] sm:$0xff] %vm365_vm1, %v576_v10 }
 0x10a PF: > { %s16_s20 = sadd.s32 1, %s824_s20   ;;  %s951_s18 = smov %s820_s19 }
 0x10b   : > { %p13_p5 = scmp.ge.s32.totalorder %s16_s20, 4   ;;  %s952_s19 = smov %s954_s21 }
 0x10d   :  { %15 = sbr.rel (!%p13_p5) target bundleno = 2 (0x2), region = 86 }

// kernel: a_call__.3
= control target key start
LH: loop header
LB: loop body
LE: loop exit
PB: predicated region body
PF: predicated region fallthrough
CT: control target
= control target key end

     0   :  { %s876_s18 = smov 0   ;;  %s878_s19 = smov 0   ;;  %s954_s0 = inlined_call_operand.vmem [shape: bf16[2,40,2], index: 0, kind: input, shape index: {}, may-alias: {0,1}]   ;;  %s955_s1 = inlined_call_operand.vmem [shape: bf16[2,40,2], index: 1, kind: input, shape index: {}, may-alias: {0,1}]   ;;  %s956_s2 = inlined_call_operand.vmem [shape: bf16[2,2,16], index: 2, kind: input, shape index: {}]   ;;  %s957_s3 = inlined_call_operand.vmem [shape: f32[8,2], index: 3, kind: input, shape index: {}]   ;;  %s958_s4 = inlined_call_operand.vmem [shape: bf16[2,32,16], index: 4, kind: output, shape index: {0}]   ;;  %s959_s5 = inlined_call_operand.vmem [shape: f32[2,8,16], index: 5, kind: output, shape index: {1}]  }
   0x1   :  { %s880_s20 = smov 0  }
   0x2 LB: > { %s28_s3 = sadd.s32 1, %s839_s19  ;;  %p740_p0 = scmp.ge.s32.totalorder %s843_s20, 1  ;;  %s843_s20 = sphi %s880_s20, %s16_s20   ;;  %s839_s19 = sphi %s878_s19, %s961_s19   ;;  %s835_s18 = sphi %s876_s18, %s960_s18  }
   0x3   : > { %p30_p1 = scmp.ge.s32.totalorder %s28_s3, 2  ;;  %p242_p2 = scmp.lt.s32.totalorder %s843_s20, 3 }
   0x5   : > { %s963_s3 = smov (%p30_p1, %s28_s3), 0  ;;  %p243_p3 = pnand %p740_p0, %p242_p2 }
   0x6   : > { %p301_p4 = scmp.lt.s32.totalorder (!%p243_p3), %s835_s18, 1 }
   0x7   : > { %246 = sbr.rel (%p243_p3) target bundleno = 265 (0x109), region = 36 }
   0xc   : > { %v364_v0 = vld [vmem:[%s956_s2] sm:$0x1]  ;;  %vm395_vm0 = vcmask 1040384   ;;  %v746_v2 = vld [vmem:[%s956_s2 + $0x1] sm:$0x1]  ;;  %s965_s18 = smov (!%p301_p4, %s835_s18), 1  ;;  %v505_v33 = vlaneseq }
   0xd   : > { %792 = vmatprep.subr.msk.bf16.mxu1 %vm395_vm0, %v364_v0  ;;  %v453_v1 = vsel %vm395_vm0, %v364_v0, 0  ;;  %791 = vmatprep.subr.msk.bf16.mxu0 %vm395_vm0, %v746_v2  ;;  %v397_v3 = vsel %vm395_vm0, %v746_v2, 0  ;;  %s793_s25 = smul.u32 20, %s965_s18  ;;  %vm349_vm1 = vcmask 15360   ;;  %vm368_vm2 = vsmask.f32 7424 }
   0xe   : > { %786 = vmatpush3.bf16.msra.mxu1 %v453_v1  ;;  %780 = vmatpush3.bf16.msra.mxu0 %v397_v3  ;;  %s745_s8 = sshll.u32 %s965_s18, 3  ;;  %vm552_vm3 = vcmask 130048   ;;  %v845_v32 = vmov 0.0   ;;  %v506_v35 = vshrl.u32 %v505_v33, 7  ;;  %s759_s12 = sshll.u32 %s965_s18, 4  ;;  %vm547_vm4 = vcmask 125952  }
   0xf   : > { %s308_s28 = scalar_lea.vmem %s954_s0, %s793_s25  ;;  %s758_s29 = sadd.s32 16, %s793_s25 }
  0x10   : > { %s323_s7 = scalar_lea.vmem %s955_s1, %s758_s29  ;;  %v765_v4 = vld [vmem:[%s308_s28] sm:$0xff]   ;;  %v772_v5 = vld [vmem:[%s308_s28 + $0x8] sm:$0xff]   ;;  %s922_s11 = scalar_lea.vmem %s959_s5, %s745_s8  ;;  %v509_v39 = vadd.s32 24, %v506_v35  ;;  %vm583_vm6 = vcmp.eq.s32.totalorder %v506_v35, 0  ;;  %vm587_vm7 = vcmp.eq.s32.totalorder %v506_v35, 1 }
  0x11   : > { %v766_v6 = vunpack.c.l.bf16 %v765_v4  ;;  %v767_v7 = vunpack.c.h.bf16 %v765_v4  ;;  %v770_v8 = vunpack.c.l.bf16 %v772_v5  ;;  %v771_v9 = vunpack.c.h.bf16 %v772_v5  ;;  %v354_v10 = vld [vmem:[%s323_s7] sm:$0xf]  ;;  %596 = vst.msk [vmem:[%s922_s11] sm:$0xff] %vm552_vm3, %v845_v32  ;;  %s334_s15 = scalar_lea.vmem %s958_s4, %s759_s12 }
  0x12   : > { %v355_v11 = vunpack.c.l.bf16 %v354_v10  ;;  %vm518_vm5 = vcmp.lt.s32.totalorder %v509_v39, 31 }
  0x13   : > { %350 = vst.msk [vmem:[#allocation2] sm:$0xff] %vm349_vm1, %v766_v6  ;;  %351 = vst.msk [vmem:[#allocation2 + $0x8] sm:$0xff] %vm349_vm1, %v767_v7 }
  0x14   : > { %352 = vst.msk [vmem:[#allocation2 + $0x10] sm:$0xff] %vm349_vm1, %v770_v8  ;;  %353 = vst.msk [vmem:[#allocation2 + $0x18] sm:$0xff] %vm349_vm1, %v771_v9 }
  0x15   : > { %356 = vst.msk [vmem:[#allocation2 + $0x20] sm:$0xff] %vm349_vm1, %v355_v11 }
  0x1a   : > { %v357_v12 = vld [vmem:[#allocation2] sm:$0xff]  ;;  %v358_v13 = vld [vmem:[#allocation2 + $0x8] sm:$0xff] }
  0x1b   : > { %v359_v14 = vld [vmem:[#allocation2 + $0x10] sm:$0xff]  ;;  %v362_v15 = vpack.c.bf16 %v358_v13, %v357_v12  ;;  %v360_v16 = vld [vmem:[#allocation2 + $0x18] sm:$0xff] }
  0x1c   : > { %v361_v17 = vld [vmem:[#allocation2 + $0x20] sm:$0xff]  ;;  %v363_v18 = vpack.c.bf16 %v360_v16, %v359_v14 }
  0x1d   : > { %v365_v19 = vpack.c.bf16 %v361_v17, %v361_v17  ;;  %787 = vmatprep.mubr.msk.bf16.mxu1 %vm349_vm1, %v362_v15  ;;  %v370_v20 = vshrl.u32 %v362_v15, 16  ;;  %v372_v21 = vshll.u32 %v362_v15, 16 }
  0x1e   : > { %788 = vmatmul.mubr.msk.bf16.vlgmr.msra.gmra.mxu1 %vm349_vm1, %v363_v18  ;;  %v377_v22 = vshll.u32 %v363_v18, 16  ;;  %v381_v23 = vshrl.u32 %v363_v18, 16 }
  0x1f   : > { %v385_v24 = vshll.u32 %v365_v19, 16  ;;  %v374_v25 = vrot.slane %v372_v21, 1  ;;  %v597_v21 = vld [vmem:[%s922_s11] sm:$0xff] }
  0x20   : > { %v379_v26 = vrot.slane %v377_v22, 1 }
  0x21   : > { %v387_v27 = vrot.slane %v385_v24, 1  ;;  %v375_v28 = vor.u32 %v374_v25, %v370_v20 }
  0x22   : > { %v383_v29 = vor.u32 %v381_v23, %v379_v26 }
  0x23   : > { %v380_v30 = vsel %vm368_vm2, %v375_v28, %v379_v26 }
  0x24   : > { %781 = vmatprep.mubr.msk.bf16.mxu0 %vm349_vm1, %v380_v30  ;;  %v388_v31 = vsel %vm368_vm2, %v383_v29, %v387_v27 }
  0x25   : > { %782 = vmatmul.mubr.msk.bf16.vlgmr.msra.gmra.mxu0 %vm349_vm1, %v388_v31 }
  0xde   : > { %v789_v34 = vpop.f32.mrf.mxu1 }
  0xe0   : > { %v489_v36 = vpop.f32.mrf.mxu1 }
  0xe2   : > { %v790_v40 = vpop.f32.mrf.mxu1 }
  0xe4   : > { %v492_v46 = vpop.f32.mrf.mxu1 }
  0xe5   : > { %v783_v37 = vpop.f32.mrf.mxu0 }
  0xe6   : > { %v498_v38 = vadd.f32 %v789_v34, %v783_v37 }
  0xe7   : > { %v433_v41 = vpop.f32.mrf.mxu0 }
  0xe8   : > { %v762_v42 = vpack.c.bf16 %v498_v38, %v498_v38  ;;  %v490_v43 = vadd.f32 %v489_v36, %v433_v41  ;;  %v568_v54 = vmul.f32 %v498_v38, %v498_v38  ;;  %v556_v59 = vsel %vm552_vm3, %v498_v38, 0.0 }
  0xe9   : > { %v784_v44 = vpop.f32.mrf.mxu0 }
  0xea   : > { %550 = vst.msk [vmem:[%s334_s15 + $0x8] sm:$0xf] %vm547_vm4, %v762_v42  ;;  %v760_v45 = vpack.c.bf16 %v490_v43, %v490_v43  ;;  %v501_v47 = vadd.f32 %v790_v40, %v784_v44  ;;  %v566_v50 = vmul.f32 %v490_v43, %v490_v43  ;;  %v553_v55 = vsel %vm552_vm3, %v490_v43, 0.0 }
  0xeb   : > { %v436_v48 = vpop.f32.mrf.mxu0  ;;  %v573_v1 = vsel %vm552_vm3, %v568_v54, 0.0 }
  0xec   : > { %548 = vst.msk [vmem:[%s334_s15] sm:$0xf] %vm547_vm4, %v760_v45  ;;  %v493_v49 = vadd.f32 %v492_v46, %v436_v48  ;;  %v530_v51 = vsel %vm518_vm5, %v501_v47, 0.0  ;;  %v570_v60 = vsel %vm552_vm3, %v566_v50, 0.0 }
  0xed   : > { %v763_v52 = vpack.c.bf16 %v530_v51, %v530_v51  ;;  %v569_v61 = vmul.f32 %v530_v51, %v530_v51  ;;  %v558_v2 = vsel %vm552_vm3, %v530_v51, 0.0 }
  0xee   : > { %v761_v53 = vpack.c.bf16 %v493_v49, %v493_v49  ;;  %v554_v56 = vsel %vm552_vm3, %v493_v49, 0.0  ;;  %v567_v57 = vmul.f32 %v493_v49, %v493_v49 }
  0xef   : > { %551 = vst.msk [vmem:[%s334_s15 + $0xc] sm:$0xf] %vm547_vm4, %v763_v52  ;;  %v555_v58 = vadd.f32 %v554_v56, %v553_v55  ;;  %v575_v5 = vsel %vm552_vm3, %v569_v61, 0.0 }
  0xf0   : > { %549 = vst.msk [vmem:[%s334_s15 + $0x4] sm:$0xf] %vm547_vm4, %v761_v53  ;;  %v571_v62 = vsel %vm552_vm3, %v567_v57, 0.0 }
  0xf1   : > { %v557_v63 = vadd.f32 %v556_v59, %v555_v58  ;;  %v572_v0 = vadd.f32 %v571_v62, %v570_v60 }
  0xf3   : > { %v559_v3 = vadd.f32 %v558_v2, %v557_v63  ;;  %v574_v4 = vadd.f32 %v573_v1, %v572_v0 }
  0xf5   : > { %v560_v6 = vrot.slane %v559_v3, 4  ;;  %v576_v7 = vadd.f32 %v575_v5, %v574_v4 }
  0xf7   : > { %v561_v8 = vadd.f32 %v560_v6, %v559_v3  ;;  %v577_v9 = vrot.slane %v576_v7, 4 }
  0xf9   : > { %v562_v10 = vrot.slane %v561_v8, 2  ;;  %v578_v11 = vadd.f32 %v577_v9, %v576_v7 }
  0xfb   : > { %v563_v12 = vadd.f32 %v562_v10, %v561_v8  ;;  %v579_v13 = vrot.slane %v578_v11, 2 }
  0xfd   : > { %v564_v14 = vrot.slane %v563_v12, 1  ;;  %v580_v15 = vadd.f32 %v579_v13, %v578_v11 }
  0xff   : > { %v565_v16 = vadd.f32 %v564_v14, %v563_v12  ;;  %v581_v17 = vrot.slane %v580_v15, 1 }
 0x101   : > { %v582_v18 = vadd.f32 %v581_v17, %v580_v15  ;;  %v586_v19 = vsel %vm583_vm6, %v565_v16, 0.0 }
 0x103   : > { %v590_v20 = vsel %vm587_vm7, %v582_v18, 0.0 }
 0x104   : > { %v591_v22 = vadd.f32 %v590_v20, %v586_v19 }
 0x106   : > { %v598_v23 = vadd.f32 %v597_v21, %v591_v22 }
 0x108   : > { %599 = vst.msk [vmem:[%s922_s11] sm:$0xff] %vm552_vm3, %v598_v23 }
 0x109 PF: > { %s16_s20 = sadd.s32 1, %s843_s20   ;;  %s960_s18 = smov %s839_s19 }
 0x10a   : > { %p13_p5 = scmp.ge.s32.totalorder %s16_s20, 4   ;;  %s961_s19 = smov %s963_s3 }
 0x10c   :  { %15 = sbr.rel (!%p13_p5) target bundleno = 2 (0x2), region = 86 }

</bundles_post_ra>
